<compile_context>
chip_gen: v5e
topology: v5e:2x2
jax: 0.10.0
libtpu: 0.0.40
codegen_flags: <defaults>
</compile_context>

<pallas_src>
import functools

import numpy as np

import jax
import jax.numpy as jnp
from jax.experimental import pallas as pl
from jax.experimental.pallas import tpu as pltpu


# ----------------------------------------------------------------------------
# Pallas kernel: fused static gather + concat on lane-dense 2D slabs
# ----------------------------------------------------------------------------

def _select_concat_kernel(j_ref, v_ref, o_ref, *, num_joints, num_coords,
                          extra_idxs):
    # j_ref: (TB, J*C)        joints slab (lane-dense)
    # v_ref: (TB, V*C)        vertices slab (lane-dense)
    # o_ref: (TB, (J+K)*C)    output slab
    J, C = num_joints, num_coords

    # torch.cat part 1: copy the joints slab in one wide contiguous store.
    o_ref[:, : J * C] = j_ref[...]

    # torch.index_select: indices are compile-time constants, so the gather is
    # unrolled into K static contiguous slice copies (vld/vst only, bit-exact).
    for k, idx in enumerate(extra_idxs):
        dst = (J + k) * C
        src = idx * C
        o_ref[:, dst:dst + C] = v_ref[:, src:src + C]


def vertex_joint_selector_forward(vertices, joints, extra_joints_idxs):
    """vertices: (B, V, C), joints: (B, J, C), extra_joints_idxs: static ints."""
    B, V, C = vertices.shape
    _, J, _ = joints.shape
    idxs = tuple(int(i) for i in np.asarray(extra_joints_idxs).reshape(-1))
    K = len(idxs)

    # Lane-dense 2D layout: flatten (row, coord) into the last axis so the
    # kernel's loads/stores are contiguous along lanes.
    j2 = joints.reshape(B, J * C)
    v2 = vertices.reshape(B, V * C)

    # Batch tiling: many batch rows per grid step (single step at demo sizes).
    TB = min(B, 64)
    grid = (pl.cdiv(B, TB),)

    kernel = functools.partial(_select_concat_kernel,
                               num_joints=J, num_coords=C, extra_idxs=idxs)

    out2 = pl.pallas_call(
        kernel,
        out_shape=jax.ShapeDtypeStruct((B, (J + K) * C), vertices.dtype),
        grid=grid,
        in_specs=[
            pl.BlockSpec((TB, J * C), lambda b: (b, 0)),
            pl.BlockSpec((TB, V * C), lambda b: (b, 0)),
        ],
        out_specs=pl.BlockSpec((TB, (J + K) * C), lambda b: (b, 0)),
        # Batch tiles are independent; harmless no-op when grid has one step.
        compiler_params=pltpu.CompilerParams(
            dimension_semantics=("parallel",)),
    )(j2, v2)

    return out2.reshape(B, J + K, C)


# ----------------------------------------------------------------------------
# Static buffer construction (mirrors VertexJointSelector.__init__)
# ----------------------------------------------------------------------------

def build_extra_joints_idxs(vertex_ids, use_hands=True, use_feet_keypoints=True):
    idxs = [vertex_ids['nose'], vertex_ids['reye'], vertex_ids['leye'],
            vertex_ids['rear'], vertex_ids['lear']]
    if use_feet_keypoints:
        idxs += [vertex_ids['LBigToe'], vertex_ids['LSmallToe'], vertex_ids['LHeel'],
                 vertex_ids['RBigToe'], vertex_ids['RSmallToe'], vertex_ids['RHeel']]
    if use_hands:
        tip_names = ['thumb', 'index', 'middle', 'ring', 'pinky']
        for hand_id in ['l', 'r']:
            for tip_name in tip_names:
                idxs.append(vertex_ids[hand_id + tip_name])
    return np.asarray(idxs, dtype=np.int64)


# ----------------------------------------------------------------------------
# Reference (pure JAX) for validation
# ----------------------------------------------------------------------------

def vertex_joint_selector_reference(vertices, joints, extra_joints_idxs):
    idx = jnp.asarray(np.asarray(extra_joints_idxs), dtype=jnp.int32)
    extra = vertices[:, idx, :]
    return jnp.concatenate([joints, extra], axis=1)


if __name__ == "__main__":
    # Small shapes consistent with the module: (B, V, 3) vertices, (B, J, 3) joints.
    B, V, J, C = 2, 128, 24, 3

    # Static vertex_ids dict (values < V); same key set the module uses.
    vertex_ids = {
        'nose': 50, 'reye': 22, 'leye': 23, 'rear': 30, 'lear': 31,
        'LBigToe': 100, 'LSmallToe': 101, 'LHeel': 102,
        'RBigToe': 110, 'RSmallToe': 111, 'RHeel': 112,
        'lthumb': 60, 'lindex': 61, 'lmiddle': 62, 'lring': 63, 'lpinky': 64,
        'rthumb': 70, 'rindex': 71, 'rmiddle': 72, 'rring': 73, 'rpinky': 74,
    }

    extra_joints_idxs = build_extra_joints_idxs(vertex_ids,
                                                use_hands=True,
                                                use_feet_keypoints=True)
    K = extra_joints_idxs.shape[0]  # 5 face + 6 feet + 10 finger tips = 21

    key = jax.random.PRNGKey(0)
    k_v, k_j = jax.random.split(key)
    vertices = jax.random.normal(k_v, (B, V, C), jnp.float32)
    joints = jax.random.normal(k_j, (B, J, C), jnp.float32)

    out = vertex_joint_selector_forward(vertices, joints, extra_joints_idxs)
    out = jax.block_until_ready(out)

    ref = vertex_joint_selector_reference(vertices, joints, extra_joints_idxs)
    assert out.shape == (B, J + K, C), out.shape
    # Pure copies -> bit-exact.
    assert jnp.array_equal(out, ref), "mismatch vs reference"

    print("KERNEL_OK")
</pallas_src>

<mosaic_0001>
module attributes {stable_mosaic.version = 11 : i64} {
  func.func @_select_concat_kernel(%arg0: i32, %arg1: memref<2x72xf32, #tpu.memory_space<vmem>>, %arg2: memref<2x384xf32, #tpu.memory_space<vmem>>, %arg3: memref<2x135xf32, #tpu.memory_space<vmem>>) attributes {dimension_semantics = [#tpu.dimension_semantics<parallel>], iteration_bounds = array<i64: 1>, scalar_prefetch = 0 : i64, scratch_operands = 0 : i64, tpu.core_type = #tpu.core_type<tc>, window_params = [{transform_indices = @transform_0, window_bounds = array<i64: 2, 72>}, {transform_indices = @transform_1, window_bounds = array<i64: 2, 384>}, {transform_indices = @transform_2, window_bounds = array<i64: 2, 135>}]} {
    %c0 = arith.constant 0 : index
    %c0_0 = arith.constant 0 : index
    %0 = vector.load %arg1[%c0, %c0_0] : memref<2x72xf32, #tpu.memory_space<vmem>>, vector<2x72xf32>
    %c0_1 = arith.constant 0 : index
    %c0_2 = arith.constant 0 : index
    %1 = vector.load %arg3[%c0_1, %c0_2] : memref<2x135xf32, #tpu.memory_space<vmem>>, vector<2x72xf32>
    tpu.vector_store %arg3[%c0_1, %c0_2], %0 {strides = array<i32>} : memref<2x135xf32, #tpu.memory_space<vmem>>, vector<2x72xf32>,
    %c0_3 = arith.constant 0 : index
    %c150 = arith.constant 150 : index
    %2 = vector.load %arg2[%c0_3, %c150] : memref<2x384xf32, #tpu.memory_space<vmem>>, vector<2x3xf32>
    %c0_4 = arith.constant 0 : index
    %c72 = arith.constant 72 : index
    %3 = vector.load %arg3[%c0_4, %c72] : memref<2x135xf32, #tpu.memory_space<vmem>>, vector<2x3xf32>
    tpu.vector_store %arg3[%c0_4, %c72], %2 {strides = array<i32>} : memref<2x135xf32, #tpu.memory_space<vmem>>, vector<2x3xf32>,
    %c0_5 = arith.constant 0 : index
    %c66 = arith.constant 66 : index
    %4 = vector.load %arg2[%c0_5, %c66] : memref<2x384xf32, #tpu.memory_space<vmem>>, vector<2x3xf32>
    %c0_6 = arith.constant 0 : index
    %c75 = arith.constant 75 : index
    %5 = vector.load %arg3[%c0_6, %c75] : memref<2x135xf32, #tpu.memory_space<vmem>>, vector<2x3xf32>
    tpu.vector_store %arg3[%c0_6, %c75], %4 {strides = array<i32>} : memref<2x135xf32, #tpu.memory_space<vmem>>, vector<2x3xf32>,
    %c0_7 = arith.constant 0 : index
    %c69 = arith.constant 69 : index
    %6 = vector.load %arg2[%c0_7, %c69] : memref<2x384xf32, #tpu.memory_space<vmem>>, vector<2x3xf32>
    %c0_8 = arith.constant 0 : index
    %c78 = arith.constant 78 : index
    %7 = vector.load %arg3[%c0_8, %c78] : memref<2x135xf32, #tpu.memory_space<vmem>>, vector<2x3xf32>
    tpu.vector_store %arg3[%c0_8, %c78], %6 {strides = array<i32>} : memref<2x135xf32, #tpu.memory_space<vmem>>, vector<2x3xf32>,
    %c0_9 = arith.constant 0 : index
    %c90 = arith.constant 90 : index
    %8 = vector.load %arg2[%c0_9, %c90] : memref<2x384xf32, #tpu.memory_space<vmem>>, vector<2x3xf32>
    %c0_10 = arith.constant 0 : index
    %c81 = arith.constant 81 : index
    %9 = vector.load %arg3[%c0_10, %c81] : memref<2x135xf32, #tpu.memory_space<vmem>>, vector<2x3xf32>
    tpu.vector_store %arg3[%c0_10, %c81], %8 {strides = array<i32>} : memref<2x135xf32, #tpu.memory_space<vmem>>, vector<2x3xf32>,
    %c0_11 = arith.constant 0 : index
    %c93 = arith.constant 93 : index
    %10 = vector.load %arg2[%c0_11, %c93] : memref<2x384xf32, #tpu.memory_space<vmem>>, vector<2x3xf32>
    %c0_12 = arith.constant 0 : index
    %c84 = arith.constant 84 : index
    %11 = vector.load %arg3[%c0_12, %c84] : memref<2x135xf32, #tpu.memory_space<vmem>>, vector<2x3xf32>
    tpu.vector_store %arg3[%c0_12, %c84], %10 {strides = array<i32>} : memref<2x135xf32, #tpu.memory_space<vmem>>, vector<2x3xf32>,
    %c0_13 = arith.constant 0 : index
    %c300 = arith.constant 300 : index
    %12 = vector.load %arg2[%c0_13, %c300] : memref<2x384xf32, #tpu.memory_space<vmem>>, vector<2x3xf32>
    %c0_14 = arith.constant 0 : index
    %c87 = arith.constant 87 : index
    %13 = vector.load %arg3[%c0_14, %c87] : memref<2x135xf32, #tpu.memory_space<vmem>>, vector<2x3xf32>
    tpu.vector_store %arg3[%c0_14, %c87], %12 {strides = array<i32>} : memref<2x135xf32, #tpu.memory_space<vmem>>, vector<2x3xf32>,
    %c0_15 = arith.constant 0 : index
    %c303 = arith.constant 303 : index
    %14 = vector.load %arg2[%c0_15, %c303] : memref<2x384xf32, #tpu.memory_space<vmem>>, vector<2x3xf32>
    %c0_16 = arith.constant 0 : index
    %c90_17 = arith.constant 90 : index
    %15 = vector.load %arg3[%c0_16, %c90_17] : memref<2x135xf32, #tpu.memory_space<vmem>>, vector<2x3xf32>
    tpu.vector_store %arg3[%c0_16, %c90_17], %14 {strides = array<i32>} : memref<2x135xf32, #tpu.memory_space<vmem>>, vector<2x3xf32>,
    %c0_18 = arith.constant 0 : index
    %c306 = arith.constant 306 : index
    %16 = vector.load %arg2[%c0_18, %c306] : memref<2x384xf32, #tpu.memory_space<vmem>>, vector<2x3xf32>
    %c0_19 = arith.constant 0 : index
    %c93_20 = arith.constant 93 : index
    %17 = vector.load %arg3[%c0_19, %c93_20] : memref<2x135xf32, #tpu.memory_space<vmem>>, vector<2x3xf32>
    tpu.vector_store %arg3[%c0_19, %c93_20], %16 {strides = array<i32>} : memref<2x135xf32, #tpu.memory_space<vmem>>, vector<2x3xf32>,
    %c0_21 = arith.constant 0 : index
    %c330 = arith.constant 330 : index
    %18 = vector.load %arg2[%c0_21, %c330] : memref<2x384xf32, #tpu.memory_space<vmem>>, vector<2x3xf32>
    %c0_22 = arith.constant 0 : index
    %c96 = arith.constant 96 : index
    %19 = vector.load %arg3[%c0_22, %c96] : memref<2x135xf32, #tpu.memory_space<vmem>>, vector<2x3xf32>
    tpu.vector_store %arg3[%c0_22, %c96], %18 {strides = array<i32>} : memref<2x135xf32, #tpu.memory_space<vmem>>, vector<2x3xf32>,
    %c0_23 = arith.constant 0 : index
    %c333 = arith.constant 333 : index
    %20 = vector.load %arg2[%c0_23, %c333] : memref<2x384xf32, #tpu.memory_space<vmem>>, vector<2x3xf32>
    %c0_24 = arith.constant 0 : index
    %c99 = arith.constant 99 : index
    %21 = vector.load %arg3[%c0_24, %c99] : memref<2x135xf32, #tpu.memory_space<vmem>>, vector<2x3xf32>
    tpu.vector_store %arg3[%c0_24, %c99], %20 {strides = array<i32>} : memref<2x135xf32, #tpu.memory_space<vmem>>, vector<2x3xf32>,
    %c0_25 = arith.constant 0 : index
    %c336 = arith.constant 336 : index
    %22 = vector.load %arg2[%c0_25, %c336] : memref<2x384xf32, #tpu.memory_space<vmem>>, vector<2x3xf32>
    %c0_26 = arith.constant 0 : index
    %c102 = arith.constant 102 : index
    %23 = vector.load %arg3[%c0_26, %c102] : memref<2x135xf32, #tpu.memory_space<vmem>>, vector<2x3xf32>
    tpu.vector_store %arg3[%c0_26, %c102], %22 {strides = array<i32>} : memref<2x135xf32, #tpu.memory_space<vmem>>, vector<2x3xf32>,
    %c0_27 = arith.constant 0 : index
    %c180 = arith.constant 180 : index
    %24 = vector.load %arg2[%c0_27, %c180] : memref<2x384xf32, #tpu.memory_space<vmem>>, vector<2x3xf32>
    %c0_28 = arith.constant 0 : index
    %c105 = arith.constant 105 : index
    %25 = vector.load %arg3[%c0_28, %c105] : memref<2x135xf32, #tpu.memory_space<vmem>>, vector<2x3xf32>
    tpu.vector_store %arg3[%c0_28, %c105], %24 {strides = array<i32>} : memref<2x135xf32, #tpu.memory_space<vmem>>, vector<2x3xf32>,
    %c0_29 = arith.constant 0 : index
    %c183 = arith.constant 183 : index
    %26 = vector.load %arg2[%c0_29, %c183] : memref<2x384xf32, #tpu.memory_space<vmem>>, vector<2x3xf32>
    %c0_30 = arith.constant 0 : index
    %c108 = arith.constant 108 : index
    %27 = vector.load %arg3[%c0_30, %c108] : memref<2x135xf32, #tpu.memory_space<vmem>>, vector<2x3xf32>
    tpu.vector_store %arg3[%c0_30, %c108], %26 {strides = array<i32>} : memref<2x135xf32, #tpu.memory_space<vmem>>, vector<2x3xf32>,
    %c0_31 = arith.constant 0 : index
    %c186 = arith.constant 186 : index
    %28 = vector.load %arg2[%c0_31, %c186] : memref<2x384xf32, #tpu.memory_space<vmem>>, vector<2x3xf32>
    %c0_32 = arith.constant 0 : index
    %c111 = arith.constant 111 : index
    %29 = vector.load %arg3[%c0_32, %c111] : memref<2x135xf32, #tpu.memory_space<vmem>>, vector<2x3xf32>
    tpu.vector_store %arg3[%c0_32, %c111], %28 {strides = array<i32>} : memref<2x135xf32, #tpu.memory_space<vmem>>, vector<2x3xf32>,
    %c0_33 = arith.constant 0 : index
    %c189 = arith.constant 189 : index
    %30 = vector.load %arg2[%c0_33, %c189] : memref<2x384xf32, #tpu.memory_space<vmem>>, vector<2x3xf32>
    %c0_34 = arith.constant 0 : index
    %c114 = arith.constant 114 : index
    %31 = vector.load %arg3[%c0_34, %c114] : memref<2x135xf32, #tpu.memory_space<vmem>>, vector<2x3xf32>
    tpu.vector_store %arg3[%c0_34, %c114], %30 {strides = array<i32>} : memref<2x135xf32, #tpu.memory_space<vmem>>, vector<2x3xf32>,
    %c0_35 = arith.constant 0 : index
    %c192 = arith.constant 192 : index
    %32 = vector.load %arg2[%c0_35, %c192] : memref<2x384xf32, #tpu.memory_space<vmem>>, vector<2x3xf32>
    %c0_36 = arith.constant 0 : index
    %c117 = arith.constant 117 : index
    %33 = vector.load %arg3[%c0_36, %c117] : memref<2x135xf32, #tpu.memory_space<vmem>>, vector<2x3xf32>
    tpu.vector_store %arg3[%c0_36, %c117], %32 {strides = array<i32>} : memref<2x135xf32, #tpu.memory_space<vmem>>, vector<2x3xf32>,
    %c0_37 = arith.constant 0 : index
    %c210 = arith.constant 210 : index
    %34 = vector.load %arg2[%c0_37, %c210] : memref<2x384xf32, #tpu.memory_space<vmem>>, vector<2x3xf32>
    %c0_38 = arith.constant 0 : index
    %c120 = arith.constant 120 : index
    %35 = vector.load %arg3[%c0_38, %c120] : memref<2x135xf32, #tpu.memory_space<vmem>>, vector<2x3xf32>
    tpu.vector_store %arg3[%c0_38, %c120], %34 {strides = array<i32>} : memref<2x135xf32, #tpu.memory_space<vmem>>, vector<2x3xf32>,
    %c0_39 = arith.constant 0 : index
    %c213 = arith.constant 213 : index
    %36 = vector.load %arg2[%c0_39, %c213] : memref<2x384xf32, #tpu.memory_space<vmem>>, vector<2x3xf32>
    %c0_40 = arith.constant 0 : index
    %c123 = arith.constant 123 : index
    %37 = vector.load %arg3[%c0_40, %c123] : memref<2x135xf32, #tpu.memory_space<vmem>>, vector<2x3xf32>
    tpu.vector_store %arg3[%c0_40, %c123], %36 {strides = array<i32>} : memref<2x135xf32, #tpu.memory_space<vmem>>, vector<2x3xf32>,
    %c0_41 = arith.constant 0 : index
    %c216 = arith.constant 216 : index
    %38 = vector.load %arg2[%c0_41, %c216] : memref<2x384xf32, #tpu.memory_space<vmem>>, vector<2x3xf32>
    %c0_42 = arith.constant 0 : index
    %c126 = arith.constant 126 : index
    %39 = vector.load %arg3[%c0_42, %c126] : memref<2x135xf32, #tpu.memory_space<vmem>>, vector<2x3xf32>
    tpu.vector_store %arg3[%c0_42, %c126], %38 {strides = array<i32>} : memref<2x135xf32, #tpu.memory_space<vmem>>, vector<2x3xf32>,
    %c0_43 = arith.constant 0 : index
    %c219 = arith.constant 219 : index
    %40 = vector.load %arg2[%c0_43, %c219] : memref<2x384xf32, #tpu.memory_space<vmem>>, vector<2x3xf32>
    %c0_44 = arith.constant 0 : index
    %c129 = arith.constant 129 : index
    %41 = vector.load %arg3[%c0_44, %c129] : memref<2x135xf32, #tpu.memory_space<vmem>>, vector<2x3xf32>
    tpu.vector_store %arg3[%c0_44, %c129], %40 {strides = array<i32>} : memref<2x135xf32, #tpu.memory_space<vmem>>, vector<2x3xf32>,
    %c0_45 = arith.constant 0 : index
    %c222 = arith.constant 222 : index
    %42 = vector.load %arg2[%c0_45, %c222] : memref<2x384xf32, #tpu.memory_space<vmem>>, vector<2x3xf32>
    %c0_46 = arith.constant 0 : index
    %c132 = arith.constant 132 : index
    %43 = vector.load %arg3[%c0_46, %c132] : memref<2x135xf32, #tpu.memory_space<vmem>>, vector<2x3xf32>
    tpu.vector_store %arg3[%c0_46, %c132], %42 {strides = array<i32>} : memref<2x135xf32, #tpu.memory_space<vmem>>, vector<2x3xf32>,
    return
  }
  func.func @transform_0(%arg0: i32) -> (i32, i32) {
    %c0_i32 = arith.constant 0 : i32
    %c0_i32_0 = arith.constant 0 : i32
    return %arg0, %c0_i32 : i32, i32
  }
  func.func @transform_1(%arg0: i32) -> (i32, i32) {
    %c0_i32 = arith.constant 0 : i32
    %c0_i32_0 = arith.constant 0 : i32
    return %arg0, %c0_i32 : i32, i32
  }
  func.func @transform_2(%arg0: i32) -> (i32, i32) {
    %c0_i32 = arith.constant 0 : i32
    %c0_i32_0 = arith.constant 0 : i32
    return %arg0, %c0_i32 : i32, i32
  }
}

</mosaic_0001>

<bundles_post_ra>
// kernel: tpu_custom_call.1
= control target key start
LH: loop header
LB: loop body
LE: loop exit
PB: predicated region body
PF: predicated region fallthrough
CT: control target
= control target key end

     0   :  { %7 = vsyncpa [#allocation3], 0  ;;  %s335_s0 = inlined_call_operand.hbm [shape: f32[2,72], index: 0, kind: input, shape index: {}]   ;;  %s336_s1 = inlined_call_operand.hbm [shape: f32[2,384], index: 1, kind: input, shape index: {}]   ;;  %s337_s2 = inlined_call_operand.hbm [shape: f32[2,135], index: 2, kind: output, shape index: {}]  }
   0x1   :  { %8 = vsyncpa [#allocation6], 0 }
   0x2   :  { %9 = vsyncpa [#allocation4], 0  ;;  %s15_s11 = sshll.u32 %s335_s0, 4  ;;  %s301_s12 = smov [#allocation2]   ;;  %s16_s11 = int_to_ptr.hbm [resolvable:$true] %s15_s11 }
   0x3   :  { %s17_s13 = sshll.u32 %s301_s12, 4  ;;  %s26_s16 = sshll.u32 %s336_s1, 4  ;;  %s18_s13 = int_to_ptr.vmem [resolvable:$true] %s17_s13  ;;  %s27_s16 = int_to_ptr.hbm [resolvable:$true] %s26_s16 }
   0x4   :  { %20 = dma.hbm_to_vmem [thread:$0]  %s16_s11, 32, %s18_s13, [#allocation3]  }
   0x5   :  { %s302_s17 = smov [#allocation5]  }
   0x6   :  { %s28_s18 = sshll.u32 %s302_s17, 4  ;;  %s29_s18 = int_to_ptr.vmem [resolvable:$true] %s28_s18 }
   0x7   :  { %31 = dma.hbm_to_vmem [thread:$0]  %s27_s16, 96, %s29_s18, [#allocation6]  }
   0x8   :  { %295 = dma.done.wait [#allocation3], 32  }
   0x9   :  { %296 = vsyncadd [#allocation3], 4294967264 }
   0xa   :  { %297 = dma.done.wait [#allocation6], 96  }
   0xb   :  { %298 = vsyncadd [#allocation6], 4294967200  ;;  %v57_v0 = vld [vmem:[#allocation5] sm:$0x3]  ;;  %v43_v1 = vld [vmem:[#allocation5 + $0x2] sm:$0x3] }
   0xc   :  { %s303_s0 = smov 9   ;;  %s304_s19 = smov 50   ;;  %v71_v2 = vld [vmem:[#allocation5] sm:$0x3]  ;;  %v78_v5 = vld [vmem:[#allocation5 + $0x4] sm:$0x3] }
   0xd   :  { %59 = vrot.lane.b32.xlu1 %v57_v0, %s303_s0  ;;  %45 = vrot.lane.b32.xlu0 %v43_v1, %s304_s19  ;;  %s305_s20 = smov 119   ;;  %v64_v3 = vld [vmem:[#allocation5] sm:$0x3]  ;;  %s306_s1 = smov 43   ;;  %v92_v6 = vld [vmem:[#allocation5 + $0x4] sm:$0x3] }
   0xe   :  { %73 = vrot.lane.b32.xlu2 %v71_v2, %s305_s20  ;;  %v50_v4 = vld [vmem:[#allocation5] sm:$0x3]  ;;  %v85_v7 = vld [vmem:[#allocation5 + $0x4] sm:$0x3]  ;;  %s307_s21 = smov 22   ;;  %s308_s22 = smov 53  }
   0xf   :  { %v99_v8 = vld [vmem:[#allocation5 + $0x4] sm:$0x3]  ;;  %v120_v11 = vld [vmem:[#allocation5 + $0x2] sm:$0x3]  ;;  %s309_s23 = smov 38   ;;  %vm41_vm0 = vcmask 582656  }
  0x10   :  { %v113_v9 = vld [vmem:[#allocation5 + $0x4] sm:$0x3]  ;;  %v134_v12 = vld [vmem:[#allocation5 + $0x2] sm:$0x3]  ;;  %v40_v21 = vld [vmem:[#allocation2] sm:$0x3] }
  0x11   :  { %v106_v10 = vld [vmem:[#allocation5 + $0x4] sm:$0x3]  ;;  %v127_v13 = vld [vmem:[#allocation5 + $0x2] sm:$0x3]  ;;  %42 = vst.msk [vmem:[#allocation7] sm:$0x3] %vm41_vm0, %v40_v21 }
  0x12   :  { %v141_v14 = vld [vmem:[#allocation5 + $0x2] sm:$0x3]  ;;  %vm48_vm1 = vcmask 607808   ;;  %vm55_vm2 = vcmask 632408   ;;  %vm62_vm3 = vcmask 657008   ;;  %vm69_vm4 = vcmask 681608  }
  0x13   :  { %v169_v15 = vld [vmem:[#allocation5 + $0x2] sm:$0x3]  ;;  %vm76_vm5 = vcmask 706208   ;;  %vm83_vm6 = vcmask 730808   ;;  %vm90_vm7 = vcmask 755408   ;;  %vm97_vm8 = vcmask 780008  }
  0x14   :  { %v148_v16 = vld [vmem:[#allocation5 + $0x2] sm:$0x3]  ;;  %vm104_vm9 = vcmask 804608   ;;  %vm111_vm10 = vcmask 829208   ;;  %vm118_vm11 = vcmask 853808   ;;  %vm125_vm12 = vcmask 878408  }
  0x15   :  { %66 = vrot.lane.b32.xlu1 %v64_v3, %s305_s20  ;;  %52 = vrot.lane.b32.xlu0 %v50_v4, %s303_s0  ;;  %v155_v17 = vld [vmem:[#allocation5 + $0x2] sm:$0x3]  ;;  %vm132_vm13 = vcmask 903008   ;;  %vm139_vm14 = vcmask 927608   ;;  %vm146_vm15 = vcmask 952208   ;;  %vm153_vm0 = vcmask 976808  }
  0x16   :  { %80 = vrot.lane.b32.xlu2 %v78_v5, %s306_s1  ;;  %v162_v18 = vld [vmem:[#allocation5 + $0x2] sm:$0x3]  ;;  %s310_s24 = smov [#allocation7]   ;;  %s202_s28 = sshll.u32 %s337_s2, 4  ;;  %s203_s28 = int_to_ptr.hbm [resolvable:$true] %s202_s28 }
  0x17   :  { %v181_v19 = vld [vmem:[#allocation5 + $0x2] sm:$0x3]  ;;  %s200_s25 = sshll.u32 %s310_s24, 4  ;;  %s201_s25 = int_to_ptr.vmem [resolvable:$true] %s200_s25 }
  0x18   :  { %v188_v20 = vld [vmem:[#allocation5 + $0x2] sm:$0x3] }
  0x1d   :  { %94 = vrot.lane.b32.xlu1 %v92_v6, %s306_s1  ;;  %87 = vrot.lane.b32.xlu0 %v85_v7, %s306_s1 }
  0x1e   :  { %101 = vrot.lane.b32.xlu2 %v99_v8, %s307_s21 }
  0x25   :  { %115 = vrot.lane.b32.xlu1 %v113_v9, %s307_s21  ;;  %108 = vrot.lane.b32.xlu0 %v106_v10, %s307_s21 }
  0x26   :  { %122 = vrot.lane.b32.xlu2 %v120_v11, %s308_s22 }
  0x2d   :  { %136 = vrot.lane.b32.xlu1 %v134_v12, %s308_s22  ;;  %129 = vrot.lane.b32.xlu0 %v127_v13, %s308_s22 }
  0x2e   :  { %143 = vrot.lane.b32.xlu2 %v141_v14, %s308_s22 }
  0x35   :  { %171 = vrot.lane.b32.xlu1 %v169_v15, %s309_s23  ;;  %150 = vrot.lane.b32.xlu0 %v148_v16, %s308_s22 }
  0x36   :  { %157 = vrot.lane.b32.xlu2 %v155_v17, %s309_s23 }
  0x3d   :  { %164 = vrot.lane.b32.xlu0 %v162_v18, %s309_s23  ;;  %183 = vrot.lane.b32.xlu1 %v181_v19, %s309_s23 }
  0x3e   :  { %190 = vrot.lane.b32.xlu2 %v188_v20, %s309_s23 }
  0x68   :  { %v74_v22 = vpop.permute.xlu2 %73 }
  0x70   :  { %v81_v23 = vpop.permute.xlu2 %80 }
  0x78   :  { %v102_v28 = vpop.permute.xlu2 %101 }
  0x7f   :  { %v60_v24 = vpop.permute.xlu1 %59  ;;  %v46_v25 = vpop.permute.xlu0 %45 }
  0x80   :  { %49 = vst.msk [vmem:[#allocation7] sm:$0x3] %vm48_vm1, %v46_v25  ;;  %v123_v31 = vpop.permute.xlu2 %122  ;;  %vm160_vm1 = vcmask 1001408  }
  0x87   :  { %v67_v26 = vpop.permute.xlu1 %66  ;;  %v53_v27 = vpop.permute.xlu0 %52 }
  0x88   :  { %56 = vst.msk [vmem:[#allocation7] sm:$0x3] %vm55_vm2, %v53_v27  ;;  %v144_v34 = vpop.permute.xlu2 %143  ;;  %vm177_vm2 = vcmask 1042416  }
  0x89   :  { %63 = vst.msk [vmem:[#allocation7] sm:$0x3] %vm62_vm3, %v60_v24  ;;  %vm178_vm3 = vcmask 3074  }
  0x8a   :  { %70 = vst.msk [vmem:[#allocation7] sm:$0x3] %vm69_vm4, %v67_v26  ;;  %vm174_vm4 = vcmask 310272  }
  0x8b   :  { %77 = vst.msk [vmem:[#allocation7] sm:$0x3] %vm76_vm5, %v74_v22  ;;  %vm167_vm5 = vcmask 1026008  }
  0x8c   :  { %84 = vst.msk [vmem:[#allocation7] sm:$0x3] %vm83_vm6, %v81_v23  ;;  %vm179_vm6 = vmor %vm178_vm3, %vm177_vm2 }
  0x8f   :  { %v95_v29 = vpop.permute.xlu1 %94  ;;  %v88_v30 = vpop.permute.xlu0 %87 }
  0x90   :  { %91 = vst.msk [vmem:[#allocation7] sm:$0x3] %vm90_vm7, %v88_v30  ;;  %v158_v37 = vpop.permute.xlu2 %157  ;;  %vm186_vm7 = vcmask 25608  }
  0x91   :  { %98 = vst.msk [vmem:[#allocation7] sm:$0x3] %vm97_vm8, %v95_v29  ;;  %vm193_vm8 = vcmask 50208  }
  0x92   :  { %105 = vst.msk [vmem:[#allocation7] sm:$0x3] %vm104_vm9, %v102_v28 }
  0x97   :  { %v116_v32 = vpop.permute.xlu1 %115  ;;  %v109_v33 = vpop.permute.xlu0 %108 }
  0x98   :  { %112 = vst.msk [vmem:[#allocation7] sm:$0x3] %vm111_vm10, %v109_v33  ;;  %v191_v44 = vpop.permute.xlu2 %190 }
  0x99   :  { %119 = vst.msk [vmem:[#allocation7] sm:$0x3] %vm118_vm11, %v116_v32 }
  0x9a   :  { %126 = vst.msk [vmem:[#allocation7] sm:$0x3] %vm125_vm12, %v123_v31 }
  0x9f   :  { %v137_v35 = vpop.permute.xlu1 %136  ;;  %v130_v36 = vpop.permute.xlu0 %129 }
  0xa0   :  { %133 = vst.msk [vmem:[#allocation7] sm:$0x3] %vm132_vm13, %v130_v36 }
  0xa1   :  { %140 = vst.msk [vmem:[#allocation7] sm:$0x3] %vm139_vm14, %v137_v35 }
  0xa2   :  { %147 = vst.msk [vmem:[#allocation7] sm:$0x3] %vm146_vm15, %v144_v34 }
  0xa7   :  { %v172_v38 = vpop.permute.xlu1 %171  ;;  %v151_v39 = vpop.permute.xlu0 %150 }
  0xa8   :  { %154 = vst.msk [vmem:[#allocation7] sm:$0x3] %vm153_vm0, %v151_v39  ;;  %v173_v40 = vrot.slane %v172_v38, 6 }
  0xa9   :  { %161 = vst.msk [vmem:[#allocation7] sm:$0x3] %vm160_vm1, %v158_v37 }
  0xaa   :  { %v175_v43 = vsel %vm174_vm4, %v173_v40, %v172_v38 }
  0xaf   :  { %v165_v41 = vpop.permute.xlu0 %164  ;;  %v184_v42 = vpop.permute.xlu1 %183 }
  0xb0   :  { %168 = vst.msk [vmem:[#allocation7] sm:$0x3] %vm167_vm5, %v165_v41 }
  0xb1   :  { %180 = vst.msk [vmem:[#allocation7] sm:$0xf] %vm179_vm6, %v175_v43 }
  0xb2   :  { %187 = vst.msk [vmem:[#allocation7 + $0x2] sm:$0x3] %vm186_vm7, %v184_v42 }
  0xb3   :  { %194 = vst.msk [vmem:[#allocation7 + $0x2] sm:$0x3] %vm193_vm8, %v191_v44 }
  0xb4   :  { %205 = dma.vmem_to_hbm [thread:$0]  %s201_s25, 64, %s203_s28, [#allocation4]  }
  0xb5   :  { %299 = dma.done.wait [#allocation4], 64  }
  0xb6   :  { %300 = vsyncadd [#allocation4], 4294967232 }
  0xb7   :  { %210 = vsyncpa [#allocation3], 1 }
  0xb8   :  { %211 = vsyncpa [#allocation6], 1 }
  0xb9   :  { %212 = vsyncpa [#allocation4], 1 }

</bundles_post_ra>
